<compile_context>
chip_gen: v6e
topology: v6e:2x2x1
jax: 0.10.0
libtpu: 0.0.40
codegen_flags: <defaults>
</compile_context>

<pallas_src>
import jax
import jax.numpy as jnp
from jax.experimental import pallas as pl
from jax.experimental.pallas import tpu as pltpu


# ----------------------------------------------------------------------------- kernels

def _fused_single_block_kernel(x_ref, w_ref, b_ref, pi_ref, o_ref):
    # Whole problem resident in VMEM: H = X@W + b, out = Pi@H. One call, no grid.
    h = (jnp.dot(x_ref[...], w_ref[...], preferred_element_type=jnp.float32)
         + b_ref[...])
    o_ref[...] = jnp.dot(pi_ref[...], h.astype(pi_ref.dtype),
                         preferred_element_type=jnp.float32).astype(o_ref.dtype)


def _linear_kernel(x_ref, w_ref, b_ref, h_ref):
    # One row strip of H = X@W + b (bf16 output halves H's HBM stream).
    h_ref[...] = (jnp.dot(x_ref[...], w_ref[...],
                          preferred_element_type=jnp.float32)
                  + b_ref[...]).astype(h_ref.dtype)


def _propagate_kernel(pi_ref, h_ref, o_ref, acc_ref):
    # out[i] = sum_k Pi[i, k] @ H[k]  — rows "parallel", K innermost "arbitrary".
    k = pl.program_id(1)

    @pl.when(k == 0)
    def _():
        acc_ref[...] = jnp.zeros_like(acc_ref)

    acc_ref[...] += jnp.dot(pi_ref[...], h_ref[...],
                            preferred_element_type=jnp.float32)

    @pl.when(k == pl.num_programs(1) - 1)
    def _():
        o_ref[...] = acc_ref[...].astype(o_ref.dtype)


# ----------------------------------------------------------------------------- helpers

def _round_up(x, m):
    return ((x + m - 1) // m) * m


def _vmem_capacity_bytes():
    # Generation-aware VMEM size (128 MiB on v5e/v6e, 64 MiB per TC on v7x).
    try:
        return int(pltpu.get_tpu_info().vmem_capacity_bytes)
    except Exception:
        return 64 * 1024 * 1024  # conservative fallback


def _pick_k_tile(N):
    # Largest K chunk from a fixed menu keeping zero-pad overhead <= 12.5% of N.
    for cand in (2048, 1024, 512, 256):
        if ((-N) % cand) * 8 <= N:
            return cand
    return 256


# ----------------------------------------------------------------------------- wrapper

def ppnp1_forward(X, Pi, W, b):
    """PPNP1.forward: out = Pi @ (X @ W + b).

    X:(N,F), Pi:(N,N), W:(F,C) (= torch weight.T), b:(C,) or (1,C) -> (N,C) f32.
    """
    N, F = X.shape
    C = W.shape[-1]
    C_pad = _round_up(C, 128)          # lane-dense output / H layout

    cap = _vmem_capacity_bytes()

    Xf = X.astype(jnp.float32)
    Wp = jnp.pad(W.astype(jnp.float32), ((0, 0), (0, C_pad - C)))
    bp = jnp.pad(jnp.reshape(b, (1, C)).astype(jnp.float32),
                 ((0, 0), (0, C_pad - C)))
    # Pi is the dominant HBM stream -> bf16 (accumulation stays f32 in-kernel).
    Pib = Pi.astype(jnp.bfloat16)

    # Rough single-block VMEM footprint: Pi(bf16) + X/W/b(f32) + H(f32+bf16) + out.
    single_bytes = (2 * N * N + 4 * (N * F + F * C_pad + C_pad)
                    + (4 + 2 + 4) * N * C_pad)

    if single_bytes <= int(0.55 * cap):
        # Small/moderate N: single fused VMEM-resident block, no grid, no
        # per-step overhead (architecture floor at the demo shapes).
        vmem_spec = pl.BlockSpec(memory_space=pltpu.MemorySpace.VMEM)
        out_pad = pl.pallas_call(
            _fused_single_block_kernel,
            out_shape=jax.ShapeDtypeStruct((N, C_pad), jnp.float32),
            in_specs=[vmem_spec, vmem_spec, vmem_spec, vmem_spec],
            out_specs=vmem_spec,
            compiler_params=pltpu.CompilerParams(
                vmem_limit_bytes=min(int(0.9 * cap), single_bytes + (8 << 20))),
        )(Xf, Wp, bp, Pib)
        return out_pad[:, :C]

    # ------------------------------------------------------------------ large N
    tk = _pick_k_tile(N)        # K chunk (columns of Pi / rows of H)
    tn = 512                    # output-row tile of the propagation
    tm = min(512, tk)           # row tile of the linear stage (divides Nk_pad)

    Nk_pad = _round_up(N, tk)
    Nr_pad = _round_up(N, tn)

    # Zero padding keeps the K-reduction exact without relying on OOB semantics
    # (zero Pi rows/cols contribute nothing; padded output rows are sliced off).
    X_padded = jnp.pad(Xf, ((0, Nk_pad - N), (0, 0)))
    Pi_padded = jnp.pad(Pib, ((0, Nr_pad - N), (0, Nk_pad - N)))

    vmem_limit = min(int(0.75 * cap), 64 << 20)

    # Stage 1: H = X @ W + b. Tiny (2*N*C_pad*~3 bytes of HBM traffic), so the
    # HBM round-trip is negligible vs the N^2 Pi stream; un-fusing it lets the
    # propagation grid be fully megacore-parallel over rows.
    H = pl.pallas_call(
        _linear_kernel,
        out_shape=jax.ShapeDtypeStruct((Nk_pad, C_pad), jnp.bfloat16),
        grid_spec=pltpu.PrefetchScalarGridSpec(
            num_scalar_prefetch=0,
            grid=(Nk_pad // tm,),
            in_specs=[
                pl.BlockSpec((tm, F), lambda i: (i, 0)),       # X row strip
                pl.BlockSpec((F, C_pad), lambda i: (0, 0)),    # W (invariant)
                pl.BlockSpec((1, C_pad), lambda i: (0, 0)),    # b (invariant)
            ],
            out_specs=pl.BlockSpec((tm, C_pad), lambda i: (i, 0)),
        ),
        compiler_params=pltpu.CompilerParams(
            dimension_semantics=("parallel",),
            vmem_limit_bytes=vmem_limit),
    )(X_padded, Wp, bp)

    # Stage 2: out = Pi @ H. 2-D tiled, O(tile) VMEM, rows megacore-parallel.
    out_pad = pl.pallas_call(
        _propagate_kernel,
        out_shape=jax.ShapeDtypeStruct((Nr_pad, C_pad), jnp.float32),
        grid_spec=pltpu.PrefetchScalarGridSpec(
            num_scalar_prefetch=0,
            grid=(Nr_pad // tn, Nk_pad // tk),
            in_specs=[
                pl.BlockSpec((tn, tk), lambda i, k: (i, k)),      # Pi (bf16)
                pl.BlockSpec((tk, C_pad), lambda i, k: (k, 0)),   # H  (bf16)
            ],
            out_specs=pl.BlockSpec((tn, C_pad), lambda i, k: (i, 0)),
            scratch_shapes=[pltpu.VMEM((tn, C_pad), jnp.float32)],  # f32 acc
        ),
        compiler_params=pltpu.CompilerParams(
            dimension_semantics=("parallel", "arbitrary"),
            vmem_limit_bytes=vmem_limit),
    )(Pi_padded, H)
    return out_pad[:N, :C]


# ----------------------------------------------------------------------------- demo

if __name__ == "__main__":
    # Small shapes consistent with the module: N nodes, nfeat features, nclass outputs.
    N, nfeat, nclass = 128, 64, 16

    key = jax.random.PRNGKey(0)
    kx, kpi, kw, kb = jax.random.split(key, 4)

    # Node features.
    X = jax.random.normal(kx, (N, nfeat), dtype=jnp.float32)

    # Dense PPR matrix Pi (row-stochastic, like (1-alpha)(I - alpha*Ahat)^-1 would be).
    Pi_raw = jax.nn.softplus(jax.random.normal(kpi, (N, N), dtype=jnp.float32))
    Pi = Pi_raw / jnp.sum(Pi_raw, axis=-1, keepdims=True)

    # nn.Linear(nfeat, nclass) parameters (PyTorch-style uniform bound); W = weight.T.
    bound = 1.0 / (nfeat ** 0.5)
    W = jax.random.uniform(kw, (nfeat, nclass), jnp.float32, -bound, bound)
    b = jax.random.uniform(kb, (1, nclass), jnp.float32, -bound, bound)

    out = jax.block_until_ready(ppnp1_forward(X, Pi, W, b))

    # Reference check in plain JAX (same default MXU precision as the kernel).
    ref = Pi @ (X @ W + b)
    assert out.shape == (N, nclass)
    err = jnp.max(jnp.abs(out - ref))
    assert jnp.allclose(out, ref, atol=2e-3, rtol=2e-3), f"max err {err}"

    print("KERNEL_OK")
</pallas_src>

<mosaic_0001>
module attributes {stable_mosaic.version = 11 : i64} {
  func.func @_fused_single_block_kernel(%arg0: memref<128x64xf32, #tpu.memory_space<vmem>>, %arg1: memref<64x128xf32, #tpu.memory_space<vmem>>, %arg2: memref<1x128xf32, #tpu.memory_space<vmem>>, %arg3: memref<128x128xbf16, #tpu.memory_space<vmem>>, %arg4: memref<128x128xf32, #tpu.memory_space<vmem>>) attributes {dimension_semantics = [], scalar_prefetch = 0 : i64, scratch_operands = 0 : i64, tpu.core_type = #tpu.core_type<tc>} {
    %c0 = arith.constant 0 : index
    %c0_0 = arith.constant 0 : index
    %0 = vector.load %arg0[%c0, %c0_0] : memref<128x64xf32, #tpu.memory_space<vmem>>, vector<128x64xf32>
    %c0_1 = arith.constant 0 : index
    %c0_2 = arith.constant 0 : index
    %1 = vector.load %arg1[%c0_1, %c0_2] : memref<64x128xf32, #tpu.memory_space<vmem>>, vector<64x128xf32>
    %cst = arith.constant dense<0.000000e+00> : vector<128x128xf32>
    %2 = tpu.matmul %0, %1, %cst {dimension_numbers = #tpu.dot_dimension_numbers<[1], [0], [0], [1], [0, 0, 1, 1], [], []>} : vector<128x64xf32>, vector<64x128xf32>, vector<128x128xf32> -> vector<128x128xf32>
    %c0_3 = arith.constant 0 : index
    %c0_4 = arith.constant 0 : index
    %3 = vector.load %arg2[%c0_3, %c0_4] : memref<1x128xf32, #tpu.memory_space<vmem>>, vector<1x128xf32>
    %4 = vector.broadcast %3 : vector<1x128xf32> to vector<128x128xf32>
    %5 = arith.addf %2, %4 : vector<128x128xf32>
    %c0_5 = arith.constant 0 : index
    %c0_6 = arith.constant 0 : index
    %6 = vector.load %arg3[%c0_5, %c0_6] : memref<128x128xbf16, #tpu.memory_space<vmem>>, vector<128x128xbf16>
    %7 = arith.truncf %5 : vector<128x128xf32> to vector<128x128xbf16>
    %cst_7 = arith.constant dense<0.000000e+00> : vector<128x128xf32>
    %8 = tpu.matmul %6, %7, %cst_7 {dimension_numbers = #tpu.dot_dimension_numbers<[1], [0], [0], [1], [0, 0, 1, 1], [], []>} : vector<128x128xbf16>, vector<128x128xbf16>, vector<128x128xf32> -> vector<128x128xf32>
    %c0_8 = arith.constant 0 : index
    %c0_9 = arith.constant 0 : index
    %9 = vector.load %arg4[%c0_8, %c0_9] : memref<128x128xf32, #tpu.memory_space<vmem>>, vector<128x128xf32>
    tpu.vector_store %arg4[%c0_8, %c0_9], %8 {strides = array<i32>} : memref<128x128xf32, #tpu.memory_space<vmem>>, vector<128x128xf32>,
    return
  }
}

</mosaic_0001>

<bundles_post_ra>
// kernel: tpu_custom_call.1
= control target key start
LH: loop header
LB: loop body
LE: loop exit
PB: predicated region body
PF: predicated region fallthrough
CT: control target
= control target key end

     0   :  { %vm50_vm0 = vcmask 523264   ;;  %s780_s0 = inlined_call_operand.vmem [shape: f32[128,64], index: 0, kind: input, shape index: {}]   ;;  %s781_s1 = inlined_call_operand.vmem [shape: f32[64,128], index: 1, kind: input, shape index: {}]   ;;  %s782_s2 = inlined_call_operand.vmem [shape: f32[1,128], index: 2, kind: input, shape index: {}]   ;;  %s783_s3 = inlined_call_operand.vmem [shape: bf16[128,128], index: 3, kind: input, shape index: {}]   ;;  %s784_s4 = inlined_call_operand.hbm [shape: f32[128,128], index: 4, kind: output, shape index: {}]  }
   0x1   :  { %v42_v0 = vld [vmem:[%s781_s1 + $0x38] sm:$0xff]  ;;  %v41_v1 = vld [vmem:[%s781_s1 + $0x30] sm:$0xff]  ;;  %v40_v2 = vld [vmem:[%s781_s1 + $0x28] sm:$0xff] }
   0x2   :  { %510 = vmatprep.subr.mxu0 %v42_v0  ;;  %v19_v3 = vld [vmem:[%s780_s0] sm:$0xff]  ;;  %v38_v5 = vld [vmem:[%s781_s1 + $0x18] sm:$0xff]  ;;  %v37_v6 = vld [vmem:[%s781_s1 + $0x10] sm:$0xff] }
   0x3   :  { %511 = vmatpush3.msra.mxu0 %v42_v0  ;;  %526 = vmatprep.mubr.msk.f32.mxu0 %vm50_vm0, %v19_v3  ;;  %v39_v4 = vld [vmem:[%s781_s1 + $0x20] sm:$0xff]  ;;  %v36_v7 = vld [vmem:[%s781_s1 + $0x8] sm:$0xff] }
   0x4   :  { %512 = vmatprep.subr.mxu0 %v41_v1  ;;  %v35_v8 = vld [vmem:[%s781_s1] sm:$0xff] }
   0x5   :  { %513 = vmatpush3.msra.mxu0 %v41_v1 }
   0x6   :  { %514 = vmatprep.subr.mxu0 %v40_v2 }
   0x7   :  { %515 = vmatpush3.msra.mxu0 %v40_v2 }
   0x8   :  { %516 = vmatprep.subr.mxu0 %v39_v4 }
   0x9   :  { %517 = vmatpush3.msra.mxu0 %v39_v4 }
   0xa   :  { %518 = vmatprep.subr.mxu0 %v38_v5 }
   0xb   :  { %519 = vmatpush3.msra.mxu0 %v38_v5 }
   0xc   :  { %520 = vmatprep.subr.mxu0 %v37_v6 }
   0xd   :  { %521 = vmatpush3.msra.mxu0 %v37_v6 }
   0xe   :  { %522 = vmatprep.subr.mxu0 %v36_v7 }
   0xf   :  { %9 = vsyncpa [#allocation3], 0  ;;  %523 = vmatpush3.msra.mxu0 %v36_v7  ;;  %v20_v9 = vld [vmem:[%s780_s0 + $0x8] sm:$0xff]  ;;  %v21_v10 = vld [vmem:[%s780_s0 + $0x10] sm:$0xff] }
  0x10   :  { %524 = vmatprep.subr.mxu0 %v35_v8  ;;  %v22_v11 = vld [vmem:[%s780_s0 + $0x18] sm:$0xff]  ;;  %v23_v12 = vld [vmem:[%s780_s0 + $0x20] sm:$0xff]  ;;  %v24_v13 = vld [vmem:[%s780_s0 + $0x28] sm:$0xff] }
  0x11   :  { %525 = vmatpush3.msra.mxu0 %v35_v8  ;;  %v25_v14 = vld [vmem:[%s780_s0 + $0x30] sm:$0xff]  ;;  %v26_v15 = vld [vmem:[%s780_s0 + $0x38] sm:$0xff]  ;;  %v27_v16 = vld [vmem:[%s780_s0 + $0x40] sm:$0xff] }
  0x12   :  { %527 = vmatmul.mubr.msk.f32.vlgmr.msra.gmra.mxu0 %vm50_vm0, %v20_v9  ;;  %v28_v17 = vld [vmem:[%s780_s0 + $0x48] sm:$0xff]  ;;  %v29_v18 = vld [vmem:[%s780_s0 + $0x50] sm:$0xff]  ;;  %v30_v19 = vld [vmem:[%s780_s0 + $0x58] sm:$0xff] }
  0x13   :  { %529 = vmatprep.mubr.msk.f32.mxu0 %vm50_vm0, %v21_v10  ;;  %v31_v20 = vld [vmem:[%s780_s0 + $0x60] sm:$0xff]  ;;  %v32_v21 = vld [vmem:[%s780_s0 + $0x68] sm:$0xff]  ;;  %v33_v22 = vld [vmem:[%s780_s0 + $0x70] sm:$0xff] }
  0x14   :  { %v34_v23 = vld [vmem:[%s780_s0 + $0x78] sm:$0xff]  ;;  %v601_v24 = vld [vmem:[%s783_s3 + $0x10] sm:$0xff]   ;;  %v605_v25 = vld [vmem:[%s783_s3] sm:$0xff]  }
  0x15   :  { %570 = vmatprep.mubr.bf16.mxu1 %v601_v24  ;;  %v445_v41 = vld [vmem:[%s782_s2] ss:$0 sm:$0xff]  ;;  %v602_v3 = vld [vmem:[%s783_s3 + $0x18] sm:$0xff]   ;;  %v606_v4 = vld [vmem:[%s783_s3 + $0x8] sm:$0xff]  }
  0x16   :  { %530 = vmatmul.mubr.msk.f32.gmra.mxu0 %vm50_vm0, %v22_v11  ;;  %v603_v5 = vld [vmem:[%s783_s3 + $0x20] sm:$0xff]   ;;  %v604_v6 = vld [vmem:[%s783_s3 + $0x28] sm:$0xff]   ;;  %v607_v7 = vld [vmem:[%s783_s3 + $0x30] sm:$0xff]  }
  0x17   :  { %532 = vmatprep.mubr.msk.f32.mxu0 %vm50_vm0, %v23_v12  ;;  %v608_v8 = vld [vmem:[%s783_s3 + $0x38] sm:$0xff]   ;;  %s631_s3 = smov [#allocation2]  }
  0x18   :  { %s434_s25 = sshll.u32 %s631_s3, 4  ;;  %s435_s25 = int_to_ptr.vmem [resolvable:$true] %s434_s25 }
  0x19   :  { %s609_s26 = scalar_lea.vmem %s435_s25, 2048  ;;  %p614_p1 = scmp.lt.s32.totalorder %s435_s25, %s435_s25 }
  0x1a   :  { %533 = vmatmul.mubr.msk.f32.gmra.mxu0 %vm50_vm0, %v24_v13  ;;  %p610_p0 = scmp.ne.s32.totalorder %s435_s25, %s609_s26  ;;  %p615_p2 = scmp.lt.s32.totalorder %s609_s26, %s609_s26 }
  0x1b   :  { %535 = vmatprep.mubr.msk.f32.mxu0 %vm50_vm0, %v25_v14 }
  0x1c   :  { %p616_p3 = por %p615_p2, %p614_p1 }
  0x1e   :  { %536 = vmatmul.mubr.msk.f32.gmra.mxu0 %vm50_vm0, %v26_v15  ;;  %p617_p4 = pnand %p616_p3, %p610_p0 }
  0x1f   :  { %538 = vmatprep.mubr.msk.f32.mxu0 %vm50_vm0, %v27_v16 }
  0x22   :  { %539 = vmatmul.mubr.msk.f32.gmra.mxu0 %vm50_vm0, %v28_v17 }
  0x23   :  { %541 = vmatprep.mubr.msk.f32.mxu0 %vm50_vm0, %v29_v18 }
  0x26   :  { %542 = vmatmul.mubr.msk.f32.gmra.mxu0 %vm50_vm0, %v30_v19 }
  0x27   :  { %544 = vmatprep.mubr.msk.f32.mxu0 %vm50_vm0, %v31_v20 }
  0x2a   :  { %545 = vmatmul.mubr.msk.f32.gmra.mxu0 %vm50_vm0, %v32_v21 }
  0x2b   :  { %547 = vmatprep.mubr.msk.f32.mxu0 %vm50_vm0, %v33_v22 }
  0x2e   :  { %548 = vmatmul.mubr.msk.f32.gmra.mxu0 %vm50_vm0, %v34_v23 }
  0x2f   :  { %566 = vmatprep.mubr.bf16.mxu0 %v605_v25 }
  0xd2   :  { %v753_v26 = vpop.f32.mrf.mxu0 }
  0xd3   :  { %v171_v1 = vadd.f32 %v753_v26, %v445_v41 }
  0xd4   :  { %v165_v27 = vpop.f32.mrf.mxu0 }
  0xd5   :  { %v166_v63 = vadd.f32 %v445_v41, %v165_v27 }
  0xd6   :  { %v531_v28 = vpop.f32.mrf.mxu0 }
  0xd7   :  { %v181_v62 = vadd.f32 %v531_v28, %v445_v41  ;;  %v260_v2 = vpack.c.bf16 %v171_v1, %v166_v63 }
  0xd8   :  { %v175_v29 = vpop.f32.mrf.mxu0 }
  0xd9   :  { %v176_v60 = vadd.f32 %v445_v41, %v175_v29 }
  0xda   :  { %v534_v30 = vpop.f32.mrf.mxu0 }
  0xdb   :  { %v191_v59 = vadd.f32 %v534_v30, %v445_v41  ;;  %v261_v0 = vpack.c.bf16 %v181_v62, %v176_v60 }
  0xdc   :  { %v185_v31 = vpop.f32.mrf.mxu0 }
  0xdd   :  { %v186_v57 = vadd.f32 %v445_v41, %v185_v31 }
  0xde   :  { %v537_v32 = vpop.f32.mrf.mxu0 }
  0xdf   :  { %v201_v56 = vadd.f32 %v537_v32, %v445_v41  ;;  %v262_v61 = vpack.c.bf16 %v191_v59, %v186_v57 }
  0xe0   :  { %v195_v33 = vpop.f32.mrf.mxu0 }
  0xe1   :  { %v196_v54 = vadd.f32 %v445_v41, %v195_v33 }
  0xe2   :  { %v540_v34 = vpop.f32.mrf.mxu0 }
  0xe3   :  { %v211_v53 = vadd.f32 %v540_v34, %v445_v41  ;;  %v263_v58 = vpack.c.bf16 %v201_v56, %v196_v54 }
  0xe4   :  { %v205_v35 = vpop.f32.mrf.mxu0 }
  0xe5   :  { %v206_v51 = vadd.f32 %v445_v41, %v205_v35 }
  0xe6   :  { %v543_v36 = vpop.f32.mrf.mxu0 }
  0xe7   :  { %v221_v50 = vadd.f32 %v543_v36, %v445_v41  ;;  %v264_v55 = vpack.c.bf16 %v211_v53, %v206_v51 }
  0xe8   :  { %v215_v37 = vpop.f32.mrf.mxu0 }
  0xe9   :  { %v216_v48 = vadd.f32 %v445_v41, %v215_v37 }
  0xea   :  { %v546_v38 = vpop.f32.mrf.mxu0 }
  0xeb   :  { %v231_v46 = vadd.f32 %v546_v38, %v445_v41  ;;  %v265_v52 = vpack.c.bf16 %v221_v50, %v216_v48 }
  0xec   :  { %v225_v39 = vpop.f32.mrf.mxu0 }
  0xed   :  { %v226_v43 = vadd.f32 %v445_v41, %v225_v39 }
  0xee   :  { %v549_v40 = vpop.f32.mrf.mxu0 }
  0xef   :  { %v241_v44 = vadd.f32 %v549_v40, %v445_v41  ;;  %v266_v49 = vpack.c.bf16 %v231_v46, %v226_v43 }
  0xf0   :  { %v235_v42 = vpop.f32.mrf.mxu0 }
  0xf1   :  { %v236_v45 = vadd.f32 %v445_v41, %v235_v42 }
  0xf3   :  { %v267_v47 = vpack.c.bf16 %v241_v44, %v236_v45 }
  0xf5   :  { %550 = vmatprep.subr.bf16.mxu0 %v267_v47  ;;  %582 = vmatprep.subr.bf16.mxu1 %v267_v47 }
  0xf6   :  { %551 = vmatpush3.bf16.msra.mxu0 %v267_v47  ;;  %590 = vmatpush3.bf16.msra.mxu1 %v267_v47 }
  0xf7   :  { %552 = vmatprep.subr.bf16.mxu0 %v266_v49  ;;  %583 = vmatprep.subr.bf16.mxu1 %v266_v49 }
  0xfa   :  { %553 = vmatpush3.bf16.msra.mxu0 %v266_v49  ;;  %591 = vmatpush3.bf16.msra.mxu1 %v266_v49 }
  0xfb   :  { %554 = vmatprep.subr.bf16.mxu0 %v265_v52  ;;  %584 = vmatprep.subr.bf16.mxu1 %v265_v52 }
  0xfe   :  { %555 = vmatpush3.bf16.msra.mxu0 %v265_v52  ;;  %592 = vmatpush3.bf16.msra.mxu1 %v265_v52 }
  0xff   :  { %556 = vmatprep.subr.bf16.mxu0 %v264_v55  ;;  %585 = vmatprep.subr.bf16.mxu1 %v264_v55 }
 0x102   :  { %557 = vmatpush3.bf16.msra.mxu0 %v264_v55  ;;  %593 = vmatpush3.bf16.msra.mxu1 %v264_v55 }
 0x103   :  { %558 = vmatprep.subr.bf16.mxu0 %v263_v58  ;;  %586 = vmatprep.subr.bf16.mxu1 %v263_v58 }
 0x106   :  { %559 = vmatpush3.bf16.msra.mxu0 %v263_v58  ;;  %594 = vmatpush3.bf16.msra.mxu1 %v263_v58 }
 0x107   :  { %560 = vmatprep.subr.bf16.mxu0 %v262_v61  ;;  %587 = vmatprep.subr.bf16.mxu1 %v262_v61 }
 0x10a   :  { %561 = vmatpush3.bf16.msra.mxu0 %v262_v61  ;;  %595 = vmatpush3.bf16.msra.mxu1 %v262_v61 }
 0x10b   :  { %562 = vmatprep.subr.bf16.mxu0 %v261_v0  ;;  %588 = vmatprep.subr.bf16.mxu1 %v261_v0 }
 0x10e   :  { %563 = vmatpush3.bf16.msra.mxu0 %v261_v0  ;;  %596 = vmatpush3.bf16.msra.mxu1 %v261_v0 }
 0x10f   :  { %564 = vmatprep.subr.bf16.mxu0 %v260_v2  ;;  %589 = vmatprep.subr.bf16.mxu1 %v260_v2 }
 0x112   :  { %565 = vmatpush3.bf16.msra.mxu0 %v260_v2  ;;  %597 = vmatpush3.bf16.msra.mxu1 %v260_v2 }
 0x115   :  { %571 = vmatmul.mubr.bf16.vlgmr.msra.gmra.mxu1 %v602_v3  ;;  %567 = vmatmul.mubr.bf16.vlgmr.msra.gmra.mxu0 %v606_v4 }
 0x116   :  { %574 = vmatprep.mubr.bf16.mxu1 %v603_v5 }
 0x11d   :  { %575 = vmatmul.mubr.bf16.gmra.mxu1 %v604_v6 }
 0x11e   :  { %578 = vmatprep.mubr.bf16.mxu1 %v607_v7 }
 0x125   :  { %579 = vmatmul.mubr.bf16.gmra.mxu1 %v608_v8 }
 0x1d5   :  { %v572_v9 = vpop.f32.mrf.mxu1  ;;  %v568_v10 = vpop.f32.mrf.mxu0 }
 0x1d6   :  { %419 = vst [vmem:[#allocation2 + $0x30] sm:$0xff] %v572_v9  ;;  %415 = vst [vmem:[#allocation2 + $0x10] sm:$0xff] %v568_v10 }
 0x1d7   :  { %v366_v11 = vpop.f32.mrf.mxu1  ;;  %v350_v12 = vpop.f32.mrf.mxu0 }
 0x1d8   :  { %417 = vst [vmem:[#allocation2 + $0x20] sm:$0xff] %v366_v11  ;;  %413 = vst [vmem:[#allocation2] sm:$0xff] %v350_v12 }
 0x1d9   :  { %v573_v13 = vpop.f32.mrf.mxu1  ;;  %v569_v14 = vpop.f32.mrf.mxu0 }
 0x1da   :  { %420 = vst [vmem:[#allocation2 + $0x38] sm:$0xff] %v573_v13  ;;  %416 = vst [vmem:[#allocation2 + $0x18] sm:$0xff] %v569_v14 }
 0x1db   :  { %v369_v15 = vpop.f32.mrf.mxu1  ;;  %v353_v16 = vpop.f32.mrf.mxu0 }
 0x1dc   :  { %418 = vst [vmem:[#allocation2 + $0x28] sm:$0xff] %v369_v15  ;;  %414 = vst [vmem:[#allocation2 + $0x8] sm:$0xff] %v353_v16 }
 0x1dd   :  { %v576_v17 = vpop.f32.mrf.mxu1 }
 0x1de   :  { %423 = vst [vmem:[#allocation2 + $0x50] sm:$0xff] %v576_v17 }
 0x1df   :  { %v382_v18 = vpop.f32.mrf.mxu1 }
 0x1e0   :  { %421 = vst [vmem:[#allocation2 + $0x40] sm:$0xff] %v382_v18 }
 0x1e1   :  { %v577_v19 = vpop.f32.mrf.mxu1 }
 0x1e2   :  { %424 = vst [vmem:[#allocation2 + $0x58] sm:$0xff] %v577_v19 }
 0x1e3   :  { %v385_v20 = vpop.f32.mrf.mxu1 }
 0x1e4   :  { %422 = vst [vmem:[#allocation2 + $0x48] sm:$0xff] %v385_v20 }
 0x1e5   :  { %v580_v21 = vpop.f32.mrf.mxu1 }
 0x1e6   :  { %427 = vst [vmem:[#allocation2 + $0x70] sm:$0xff] %v580_v21 }
 0x1e7   :  { %v398_v22 = vpop.f32.mrf.mxu1 }
 0x1e8   :  { %425 = vst [vmem:[#allocation2 + $0x60] sm:$0xff] %v398_v22 }
 0x1e9   :  { %v581_v23 = vpop.f32.mrf.mxu1 }
 0x1ea   :  { %428 = vst [vmem:[#allocation2 + $0x78] sm:$0xff] %v581_v23 }
 0x1eb   :  { %v401_v24 = vpop.f32.mrf.mxu1 }
 0x1ec   :  { %426 = vst [vmem:[#allocation2 + $0x68] sm:$0xff] %v401_v24 }
 0x1ed   :  { %620 = shalt.err (!%p617_p4)
}
 0x1ee   :  { %s632_s27 = smov 128   ;;  %s633_s28 = smov 8  }
 0x1ef   :  { %440 = dma.vmem_to_hbm [thread:$0]  %s435_s25, 2048, %s784_s4, [#allocation3], %s632_s27, %s632_s27, %s633_s28  }
 0x1f0   :  { %629 = dma.done.wait [#allocation3], 2048  }
 0x1f1   :  { %630 = vsyncadd [#allocation3], 4294965248 }
 0x1f2   :  { %444 = vsyncpa [#allocation3], 1 }

</bundles_post_ra>
